<compile_context>
chip_gen: v6e
topology: v6e:2x2x1
jax: 0.10.0
libtpu: 0.0.40
codegen_flags: <defaults>
</compile_context>

<pallas_src>
from functools import partial

import jax
import jax.numpy as jnp
from jax.experimental import pallas as pl
from jax.experimental.pallas import tpu as pltpu


def _identity_kernel(x_ref, o_ref):
    # Pure copy: load the whole VMEM tile and store it to the output tile.
    o_ref[...] = x_ref[...]


_MAX_BLOCK_BYTES = 6 << 20     # ~6 MiB per block; 4 live buffers (2 in + 2 out) = 24 MiB
_VMEM_LIMIT_BYTES = 48 << 20   # headroom on v5e/v6e, still under v7x's 64 MiB physical VMEM
_LANE_WIDTHS = (8192, 4096, 2048, 1024, 512, 256, 128)  # lane-dense, widest first


def _pick_tile_rows(rows, lane_width, itemsize):
    """Largest row tile that fits the block budget, divides `rows` exactly when
    possible (no masked partial last block), and is a multiple of 8 unless it is
    the full row extent."""
    max_rows = max(1, _MAX_BLOCK_BYTES // (lane_width * itemsize))
    if rows <= max_rows:
        return rows  # single full-extent block along rows
    # Largest divisor of rows that is a multiple of 8 and <= max_rows.
    t = (max_rows // 8) * 8
    while t >= 8:
        if rows % t == 0:
            return t
        t -= 8
    # Fallback: multiple of 8; last block may be partial (padded read / masked store).
    return max(8, (max_rows // 8) * 8)


@partial(jax.jit, static_argnums=(1,))
def _pallas_copy(x2, tile_rows):
    R, C = x2.shape
    return pl.pallas_call(
        _identity_kernel,
        out_shape=jax.ShapeDtypeStruct((R, C), x2.dtype),
        grid_spec=pltpu.PrefetchScalarGridSpec(
            num_scalar_prefetch=0,
            grid=(pl.cdiv(R, tile_rows),),
            in_specs=[pl.BlockSpec((tile_rows, C), lambda i: (i, 0))],
            out_specs=pl.BlockSpec((tile_rows, C), lambda i: (i, 0)),
        ),
        compiler_params=pltpu.CompilerParams(
            dimension_semantics=("parallel",),   # rows are independent -> both v7x cores
            vmem_limit_bytes=_VMEM_LIMIT_BYTES,
        ),
    )(x2)


def target_forward(x, feat_type="feature", materialize=False):
    """Pallas implementation of target.forward.

    'feature' and 'attention' are both identities.  The default (hot) path
    returns `x` unchanged with zero data movement.  Pass materialize=True to
    force a fresh buffer produced by the Pallas copy kernel.
    """
    if feat_type not in ("feature", "attention"):
        raise ValueError("Select Proper Feat Type")

    x = jnp.asarray(x)
    if not materialize:
        # Identity module: no HBM traffic, no kernel launch.
        return x

    if x.ndim == 0 or x.size == 0:
        return jnp.copy(x)

    size = x.size
    itemsize = jnp.dtype(x.dtype).itemsize

    # Largest lane width (multiple of 128) dividing the flat size -> no pad/slice.
    lane_width = next((c for c in _LANE_WIDTHS if size % c == 0), None)
    if lane_width is None:
        # TODO(synk): ragged total sizes would need pad+slice (3x HBM traffic); use XLA copy.
        return jnp.copy(x)

    rows = size // lane_width
    tile_rows = _pick_tile_rows(rows, lane_width, itemsize)

    x2 = x.reshape(rows, lane_width)
    out2 = _pallas_copy(x2, tile_rows)
    return out2.reshape(x.shape)


if __name__ == "__main__":
    key = jax.random.PRNGKey(0)
    # Small NCHW input consistent with a backbone feature map.
    x = jax.random.normal(key, (2, 4, 16, 16), dtype=jnp.float32)

    # Hot path (identity, no kernel).
    y_feat = target_forward(x, feat_type="feature")
    y_attn = target_forward(x, feat_type="attention")

    # Exercise the Pallas copy kernel once (explicit fresh-buffer request).
    y_copy = target_forward(x, feat_type="feature", materialize=True)

    jax.block_until_ready(y_feat)
    jax.block_until_ready(y_attn)
    jax.block_until_ready(y_copy)

    assert y_feat.shape == x.shape and y_feat.dtype == x.dtype
    assert y_attn.shape == x.shape and y_attn.dtype == x.dtype
    assert y_copy.shape == x.shape and y_copy.dtype == x.dtype
    assert bool(jnp.all(y_feat == x))
    assert bool(jnp.all(y_attn == x))
    assert bool(jnp.all(y_copy == x))
    print("KERNEL_OK")
</pallas_src>

<mosaic_0001>
module attributes {stable_mosaic.version = 11 : i64} {
  func.func @_identity_kernel(%arg0: i32, %arg1: memref<1x2048xf32, #tpu.memory_space<vmem>>, %arg2: memref<1x2048xf32, #tpu.memory_space<vmem>>) attributes {dimension_semantics = [#tpu.dimension_semantics<parallel>], iteration_bounds = array<i64: 1>, scalar_prefetch = 0 : i64, scratch_operands = 0 : i64, tpu.core_type = #tpu.core_type<tc>, window_params = [{transform_indices = @transform_0, window_bounds = array<i64: 1, 2048>}, {transform_indices = @transform_1, window_bounds = array<i64: 1, 2048>}]} {
    %c0 = arith.constant 0 : index
    %c0_0 = arith.constant 0 : index
    %0 = vector.load %arg1[%c0, %c0_0] : memref<1x2048xf32, #tpu.memory_space<vmem>>, vector<1x2048xf32>
    %c0_1 = arith.constant 0 : index
    %c0_2 = arith.constant 0 : index
    %1 = vector.load %arg2[%c0_1, %c0_2] : memref<1x2048xf32, #tpu.memory_space<vmem>>, vector<1x2048xf32>
    tpu.vector_store %arg2[%c0_1, %c0_2], %0 {strides = array<i32>} : memref<1x2048xf32, #tpu.memory_space<vmem>>, vector<1x2048xf32>,
    return
  }
  func.func @transform_0(%arg0: i32) -> (i32, i32) {
    %c0_i32 = arith.constant 0 : i32
    %c0_i32_0 = arith.constant 0 : i32
    return %arg0, %c0_i32 : i32, i32
  }
  func.func @transform_1(%arg0: i32) -> (i32, i32) {
    %c0_i32 = arith.constant 0 : i32
    %c0_i32_0 = arith.constant 0 : i32
    return %arg0, %c0_i32 : i32, i32
  }
}

</mosaic_0001>

<bundles_post_ra>
// kernel: _pallas_copy.1
= control target key start
LH: loop header
LB: loop body
LE: loop exit
PB: predicated region body
PF: predicated region fallthrough
CT: control target
= control target key end

     0   :  { %6 = vsyncpa [#allocation3], 0  ;;  %s104_s0 = inlined_call_operand.hbm [shape: f32[1,2048], index: 0, kind: input, shape index: {}]   ;;  %s105_s1 = inlined_call_operand.hbm [shape: f32[1,2048], index: 1, kind: output, shape index: {}]  }
   0x1   :  { %7 = vsyncpa [#allocation4], 0  ;;  %s86_s6 = smov [#allocation2]  }
   0x2   :  { %s14_s7 = sshll.u32 %s86_s6, 4  ;;  %s15_s7 = int_to_ptr.vmem [resolvable:$true] %s14_s7 }
   0x3   :  { %s50_s8 = scalar_lea.vmem %s15_s7, 256  ;;  %p55_p1 = scmp.lt.s32.totalorder %s15_s7, %s15_s7 }
   0x4   :  { %p51_p0 = scmp.ne.s32.totalorder %s15_s7, %s50_s8  ;;  %p56_p2 = scmp.lt.s32.totalorder %s50_s8, %s50_s8 }
   0x6   :  { %p57_p3 = por %p56_p2, %p55_p1 }
   0x8   :  { %p58_p4 = pnand %p57_p3, %p51_p0 }
   0xa   :  { %61 = shalt.err (!%p58_p4)
}
   0xb   :  { %17 = dma.hbm_to_vmem [thread:$0]  %s104_s0, 256, %s15_s7, [#allocation3]  }
   0xc   :  { %82 = dma.done.wait [#allocation3], 256  }
   0xd   :  { %83 = vsyncadd [#allocation3], 4294967040  ;;  %s87_s11 = smov [#allocation5]   ;;  %v21_v0 = vld [vmem:[#allocation2] sm:$0xff]  ;;  %v22_v1 = vld [vmem:[#allocation2 + $0x8] sm:$0xff] }
   0xe   :  { %s31_s12 = sshll.u32 %s87_s11, 4  ;;  %23 = vst [vmem:[#allocation5] sm:$0xff] %v21_v0  ;;  %24 = vst [vmem:[#allocation5 + $0x8] sm:$0xff] %v22_v1  ;;  %s32_s12 = int_to_ptr.vmem [resolvable:$true] %s31_s12 }
   0xf   :  { %s62_s13 = scalar_lea.vmem %s32_s12, 256  ;;  %p67_p6 = scmp.lt.s32.totalorder %s32_s12, %s32_s12 }
  0x10   :  { %p63_p5 = scmp.ne.s32.totalorder %s32_s12, %s62_s13  ;;  %p68_p7 = scmp.lt.s32.totalorder %s62_s13, %s62_s13 }
  0x12   :  { %p69_p8 = por %p68_p7, %p67_p6 }
  0x14   :  { %p70_p9 = pnand %p69_p8, %p63_p5 }
  0x16   :  { %73 = shalt.err (!%p70_p9)
}
  0x17   :  { %34 = dma.vmem_to_hbm [thread:$0]  %s32_s12, 256, %s105_s1, [#allocation4]  }
  0x18   :  { %84 = dma.done.wait [#allocation4], 256  }
  0x19   :  { %85 = vsyncadd [#allocation4], 4294967040 }
  0x1a   :  { %38 = vsyncpa [#allocation3], 1 }
  0x1b   :  { %39 = vsyncpa [#allocation4], 1 }

</bundles_post_ra>
